<compile_context>
chip_gen: v5e
topology: v5e:2x2
jax: 0.10.0
libtpu: 0.0.40
codegen_flags: <defaults>
</compile_context>

<pallas_src>
import functools

import jax
import jax.numpy as jnp
import numpy as np
from jax.experimental import pallas as pl
from jax.experimental.pallas import tpu as pltpu

LANE = 128
SUBLANE = 8


def _round_up(x, m):
    return ((x + m - 1) // m) * m


def _choose_batch_tile(B):
    """Batch tile: multiple of 8 sublanes.  Small B -> one exact tile
    (latency path).  Large B -> tiles of <=~1024 rows, >=2 grid steps
    (v7x dual TensorCore), tail padding kept small."""
    if B <= 256:
        return max(SUBLANE, _round_up(B, SUBLANE))
    TB_MAX = 1024
    n_tiles = max(2, pl.cdiv(B, TB_MAX))
    return _round_up(pl.cdiv(B, n_tiles), SUBLANE)


def policy_mean_kernel(x_ref, w1_ref, b1_ref, w2_ref, b2_ref, wm_ref, bm_ref,
                       mean_ref):
    # fc1 + ReLU: (TB, obs) bf16 @ (obs, H) bf16, f32 accumulation on the MXU.
    h1 = jnp.dot(x_ref[...], w1_ref[...],
                 preferred_element_type=jnp.float32) + b1_ref[...]
    h1 = jnp.maximum(h1, 0.0).astype(jnp.bfloat16)
    # fc2 + ReLU
    h2 = jnp.dot(h1, w2_ref[...],
                 preferred_element_type=jnp.float32) + b2_ref[...]
    h2 = jnp.maximum(h2, 0.0).astype(jnp.bfloat16)
    # fc_mean -> narrow (TB, action_dim) f32 output block.
    mean_ref[...] = jnp.dot(h2, wm_ref[...],
                            preferred_element_type=jnp.float32) + bm_ref[...]


@jax.jit
def _forward_jit(state, w1, b1, w2, b2, wm, bm, log_std):
    """Fused pad -> pallas_call -> slice (+ std) under a single jit."""
    if state.ndim == 1:          # PyTorch module unsqueezes 1-D states
        state = state[None, :]
    B, obs_dim = state.shape
    hdim_pad = w1.shape[1]
    act_dim = wm.shape[1]

    TB = _choose_batch_tile(B)
    B_pad = _round_up(B, TB)

    # Only the batch dim is padded; the streamed input stays (B_pad, obs_dim)
    # bf16 (~10x fewer HBM bytes than a 128-lane f32 padded copy).
    x = state.astype(jnp.bfloat16)
    if B_pad != B:
        x = jnp.pad(x, ((0, B_pad - B), (0, 0)))

    flops = 2 * B_pad * (obs_dim * hdim_pad + hdim_pad * hdim_pad
                         + hdim_pad * act_dim)
    bytes_accessed = (x.size * 2                                    # bf16 state
                      + (w1.size + w2.size + wm.size) * 2           # bf16 weights
                      + (b1.size + b2.size + bm.size) * 4           # f32 biases
                      + B_pad * act_dim * 4)                        # f32 mean out

    mean_padded = pl.pallas_call(
        policy_mean_kernel,
        out_shape=jax.ShapeDtypeStruct((B_pad, act_dim), jnp.float32),
        grid=(B_pad // TB,),
        in_specs=[
            pl.BlockSpec((TB, obs_dim), lambda i: (i, 0)),         # state (streamed)
            pl.BlockSpec((obs_dim, hdim_pad), lambda i: (0, 0)),   # w1 (resident)
            pl.BlockSpec((1, hdim_pad), lambda i: (0, 0)),         # b1
            pl.BlockSpec((hdim_pad, hdim_pad), lambda i: (0, 0)),  # w2
            pl.BlockSpec((1, hdim_pad), lambda i: (0, 0)),         # b2
            pl.BlockSpec((hdim_pad, act_dim), lambda i: (0, 0)),   # wm
            pl.BlockSpec((1, act_dim), lambda i: (0, 0)),          # bm
        ],
        out_specs=pl.BlockSpec((TB, act_dim), lambda i: (i, 0)),
        compiler_params=pltpu.CompilerParams(
            dimension_semantics=("parallel",)),
        cost_estimate=pl.CostEstimate(flops=flops, transcendentals=0,
                                      bytes_accessed=bytes_accessed),
    )(x, w1, b1, w2, b2, wm, bm)

    mean = mean_padded[:B]
    std = jnp.exp(log_std)       # recomputed every call -> never stale
    return mean, std


def uth_t_forward(state, params):
    """Returns (mean, std) of the Normal policy distribution (uth_t.forward)."""
    return _forward_jit(state, params["w1"], params["b1"], params["w2"],
                        params["b2"], params["wm"], params["bm"],
                        params["log_std"])


def init_params(key, obs_dim, action_dim, hdim, log_std_init=0.0):
    """nn.Linear-style U(-1/sqrt(fan_in), 1/sqrt(fan_in)) init.
    Hidden dim is zero-padded to 128 lanes; obs/action dims stay unpadded."""
    ks = jax.random.split(key, 6)

    def linear(kw, kb, fan_in, fan_out):
        bound = 1.0 / np.sqrt(fan_in)
        w = jax.random.uniform(kw, (fan_in, fan_out), jnp.float32, -bound, bound)
        b = jax.random.uniform(kb, (fan_out,), jnp.float32, -bound, bound)
        return w, b

    w1, b1 = linear(ks[0], ks[1], obs_dim, hdim)
    w2, b2 = linear(ks[2], ks[3], hdim, hdim)
    wm, bm = linear(ks[4], ks[5], hdim, action_dim)
    log_std = jnp.full((action_dim,), log_std_init, jnp.float32)

    hdim_pad = _round_up(hdim, LANE)

    def pad_w(w, rows, cols):
        out = jnp.zeros((rows, cols), jnp.float32)
        return out.at[:w.shape[0], :w.shape[1]].set(w).astype(jnp.bfloat16)

    def pad_b(b, cols):
        out = jnp.zeros((1, cols), jnp.float32)
        return out.at[0, :b.shape[0]].set(b)

    return dict(
        w1=pad_w(w1, obs_dim, hdim_pad), b1=pad_b(b1, hdim_pad),
        w2=pad_w(w2, hdim_pad, hdim_pad), b2=pad_b(b2, hdim_pad),
        wm=pad_w(wm, hdim_pad, action_dim), bm=pad_b(bm, action_dim),
        log_std=log_std,
        obs_dim=obs_dim,
        action_dim=action_dim,
    )


def reference_forward(state, params):
    """Pure-JAX reference mirroring the kernel's bf16/f32 arithmetic."""
    if state.ndim == 1:
        state = state[None, :]
    x = state.astype(jnp.bfloat16)
    h1 = jnp.maximum(jnp.dot(x, params["w1"], preferred_element_type=jnp.float32)
                     + params["b1"], 0.0).astype(jnp.bfloat16)
    h2 = jnp.maximum(jnp.dot(h1, params["w2"], preferred_element_type=jnp.float32)
                     + params["b2"], 0.0).astype(jnp.bfloat16)
    mean = (jnp.dot(h2, params["wm"], preferred_element_type=jnp.float32)
            + params["bm"])
    return mean, jnp.exp(params["log_std"])


if __name__ == "__main__":
    obs_dim, action_dim, hdim = 24, 4, 64   # BipedalWalker-like, small hidden
    key = jax.random.PRNGKey(0)
    k_param, k_state = jax.random.split(key)
    params = init_params(k_param, obs_dim, action_dim, hdim, log_std_init=0.0)

    # Small-batch acting path.
    state = jax.random.normal(k_state, (8, obs_dim), jnp.float32)
    mean, std = uth_t_forward(state, params)
    jax.block_until_ready((mean, std))
    ref_mean, ref_std = reference_forward(state, params)
    np.testing.assert_allclose(np.asarray(mean), np.asarray(ref_mean),
                               rtol=1e-3, atol=1e-3)
    np.testing.assert_allclose(np.asarray(std), np.asarray(ref_std),
                               rtol=1e-6, atol=1e-6)

    # Multi-tile path (exercises batch padding + 2-step parallel grid).
    state_big = jax.random.normal(jax.random.PRNGKey(1), (300, obs_dim),
                                  jnp.float32)
    mean_b, std_b = uth_t_forward(state_big, params)
    jax.block_until_ready((mean_b, std_b))
    ref_mean_b, _ = reference_forward(state_big, params)
    np.testing.assert_allclose(np.asarray(mean_b), np.asarray(ref_mean_b),
                               rtol=1e-3, atol=1e-3)

    print("KERNEL_OK")
</pallas_src>

<mosaic_0001>
module attributes {stable_mosaic.version = 11 : i64} {
  func.func @policy_mean_kernel(%arg0: i32, %arg1: memref<8x24xbf16, #tpu.memory_space<vmem>>, %arg2: memref<24x128xbf16, #tpu.memory_space<vmem>>, %arg3: memref<1x128xf32, #tpu.memory_space<vmem>>, %arg4: memref<128x128xbf16, #tpu.memory_space<vmem>>, %arg5: memref<1x128xf32, #tpu.memory_space<vmem>>, %arg6: memref<128x4xbf16, #tpu.memory_space<vmem>>, %arg7: memref<1x4xf32, #tpu.memory_space<vmem>>, %arg8: memref<8x4xf32, #tpu.memory_space<vmem>>) attributes {dimension_semantics = [#tpu.dimension_semantics<parallel>], iteration_bounds = array<i64: 1>, scalar_prefetch = 0 : i64, scratch_operands = 0 : i64, tpu.core_type = #tpu.core_type<tc>, window_params = [{transform_indices = @transform_0, window_bounds = array<i64: 8, 24>}, {pipeline_mode = #tpu.pipeline_mode<synchronous>, transform_indices = @transform_1, window_bounds = array<i64: 24, 128>}, {pipeline_mode = #tpu.pipeline_mode<synchronous>, transform_indices = @transform_2, window_bounds = array<i64: 1, 128>}, {pipeline_mode = #tpu.pipeline_mode<synchronous>, transform_indices = @transform_3, window_bounds = array<i64: 128, 128>}, {pipeline_mode = #tpu.pipeline_mode<synchronous>, transform_indices = @transform_4, window_bounds = array<i64: 1, 128>}, {pipeline_mode = #tpu.pipeline_mode<synchronous>, transform_indices = @transform_5, window_bounds = array<i64: 128, 4>}, {pipeline_mode = #tpu.pipeline_mode<synchronous>, transform_indices = @transform_6, window_bounds = array<i64: 1, 4>}, {transform_indices = @transform_7, window_bounds = array<i64: 8, 4>}]} {
    %c0 = arith.constant 0 : index
    %c0_0 = arith.constant 0 : index
    %0 = vector.load %arg1[%c0, %c0_0] : memref<8x24xbf16, #tpu.memory_space<vmem>>, vector<8x24xbf16>
    %c0_1 = arith.constant 0 : index
    %c0_2 = arith.constant 0 : index
    %1 = vector.load %arg2[%c0_1, %c0_2] : memref<24x128xbf16, #tpu.memory_space<vmem>>, vector<24x128xbf16>
    %cst = arith.constant dense<0.000000e+00> : vector<8x128xf32>
    %2 = tpu.matmul %0, %1, %cst {dimension_numbers = #tpu.dot_dimension_numbers<[1], [0], [0], [1], [0, 0, 1, 1], [], []>} : vector<8x24xbf16>, vector<24x128xbf16>, vector<8x128xf32> -> vector<8x128xf32>
    %c0_3 = arith.constant 0 : index
    %c0_4 = arith.constant 0 : index
    %3 = vector.load %arg3[%c0_3, %c0_4] : memref<1x128xf32, #tpu.memory_space<vmem>>, vector<1x128xf32>
    %4 = vector.broadcast %3 : vector<1x128xf32> to vector<8x128xf32>
    %5 = arith.addf %2, %4 : vector<8x128xf32>
    %cst_5 = arith.constant 0.000000e+00 : f32
    %6 = vector.broadcast %cst_5 : f32 to vector<8x128xf32>
    %7 = arith.maximumf %5, %6 : vector<8x128xf32>
    %8 = arith.truncf %7 : vector<8x128xf32> to vector<8x128xbf16>
    %c0_6 = arith.constant 0 : index
    %c0_7 = arith.constant 0 : index
    %9 = vector.load %arg4[%c0_6, %c0_7] : memref<128x128xbf16, #tpu.memory_space<vmem>>, vector<128x128xbf16>
    %cst_8 = arith.constant dense<0.000000e+00> : vector<8x128xf32>
    %10 = tpu.matmul %8, %9, %cst_8 {dimension_numbers = #tpu.dot_dimension_numbers<[1], [0], [0], [1], [0, 0, 1, 1], [], []>} : vector<8x128xbf16>, vector<128x128xbf16>, vector<8x128xf32> -> vector<8x128xf32>
    %c0_9 = arith.constant 0 : index
    %c0_10 = arith.constant 0 : index
    %11 = vector.load %arg5[%c0_9, %c0_10] : memref<1x128xf32, #tpu.memory_space<vmem>>, vector<1x128xf32>
    %12 = vector.broadcast %11 : vector<1x128xf32> to vector<8x128xf32>
    %13 = arith.addf %10, %12 : vector<8x128xf32>
    %cst_11 = arith.constant 0.000000e+00 : f32
    %14 = vector.broadcast %cst_11 : f32 to vector<8x128xf32>
    %15 = arith.maximumf %13, %14 : vector<8x128xf32>
    %16 = arith.truncf %15 : vector<8x128xf32> to vector<8x128xbf16>
    %c0_12 = arith.constant 0 : index
    %c0_13 = arith.constant 0 : index
    %17 = vector.load %arg6[%c0_12, %c0_13] : memref<128x4xbf16, #tpu.memory_space<vmem>>, vector<128x4xbf16>
    %cst_14 = arith.constant dense<0.000000e+00> : vector<8x4xf32>
    %18 = tpu.matmul %16, %17, %cst_14 {dimension_numbers = #tpu.dot_dimension_numbers<[1], [0], [0], [1], [0, 0, 1, 1], [], []>} : vector<8x128xbf16>, vector<128x4xbf16>, vector<8x4xf32> -> vector<8x4xf32>
    %c0_15 = arith.constant 0 : index
    %c0_16 = arith.constant 0 : index
    %19 = vector.load %arg7[%c0_15, %c0_16] : memref<1x4xf32, #tpu.memory_space<vmem>>, vector<1x4xf32>
    %20 = vector.broadcast %19 : vector<1x4xf32> to vector<8x4xf32>
    %21 = arith.addf %18, %20 : vector<8x4xf32>
    %c0_17 = arith.constant 0 : index
    %c0_18 = arith.constant 0 : index
    %22 = vector.load %arg8[%c0_17, %c0_18] : memref<8x4xf32, #tpu.memory_space<vmem>>, vector<8x4xf32>
    tpu.vector_store %arg8[%c0_17, %c0_18], %21 {strides = array<i32>} : memref<8x4xf32, #tpu.memory_space<vmem>>, vector<8x4xf32>,
    return
  }
  func.func @transform_0(%arg0: i32) -> (i32, i32) {
    %c0_i32 = arith.constant 0 : i32
    %c0_i32_0 = arith.constant 0 : i32
    return %arg0, %c0_i32 : i32, i32
  }
  func.func @transform_1(%arg0: i32) -> (i32, i32) {
    %c0_i32 = arith.constant 0 : i32
    %c0_i32_0 = arith.constant 0 : i32
    %c0_i32_1 = arith.constant 0 : i32
    return %c0_i32, %c0_i32_0 : i32, i32
  }
  func.func @transform_2(%arg0: i32) -> (i32, i32) {
    %c0_i32 = arith.constant 0 : i32
    %c0_i32_0 = arith.constant 0 : i32
    %c0_i32_1 = arith.constant 0 : i32
    return %c0_i32, %c0_i32_0 : i32, i32
  }
  func.func @transform_3(%arg0: i32) -> (i32, i32) {
    %c0_i32 = arith.constant 0 : i32
    %c0_i32_0 = arith.constant 0 : i32
    %c0_i32_1 = arith.constant 0 : i32
    return %c0_i32, %c0_i32_0 : i32, i32
  }
  func.func @transform_4(%arg0: i32) -> (i32, i32) {
    %c0_i32 = arith.constant 0 : i32
    %c0_i32_0 = arith.constant 0 : i32
    %c0_i32_1 = arith.constant 0 : i32
    return %c0_i32, %c0_i32_0 : i32, i32
  }
  func.func @transform_5(%arg0: i32) -> (i32, i32) {
    %c0_i32 = arith.constant 0 : i32
    %c0_i32_0 = arith.constant 0 : i32
    %c0_i32_1 = arith.constant 0 : i32
    return %c0_i32, %c0_i32_0 : i32, i32
  }
  func.func @transform_6(%arg0: i32) -> (i32, i32) {
    %c0_i32 = arith.constant 0 : i32
    %c0_i32_0 = arith.constant 0 : i32
    %c0_i32_1 = arith.constant 0 : i32
    return %c0_i32, %c0_i32_0 : i32, i32
  }
  func.func @transform_7(%arg0: i32) -> (i32, i32) {
    %c0_i32 = arith.constant 0 : i32
    %c0_i32_0 = arith.constant 0 : i32
    return %arg0, %c0_i32 : i32, i32
  }
}

</mosaic_0001>

<bundles_post_ra>
// kernel: _forward_jit.1
= control target key start
LH: loop header
LB: loop body
LE: loop exit
PB: predicated region body
PF: predicated region fallthrough
CT: control target
= control target key end

     0   :  { %vm48_vm0 = vcmask 1043456   ;;  %vm44_vm1 = vcmask 195584   ;;  %vm231_vm2 = vcmask 31744   ;;  %s435_s1 = inlined_call_operand.vmem [shape: bf16[24,128], index: 1, kind: input, shape index: {}]   ;;  %s436_s3 = inlined_call_operand.vmem [shape: bf16[128,128], index: 3, kind: input, shape index: {}]   ;;  %s437_s2 = inlined_call_operand.vmem [shape: f32[1,128], index: 2, kind: input, shape index: {}]   ;;  %s438_s0 = inlined_call_operand.vmem [shape: bf16[8,24], index: 0, kind: input, shape index: {}]   ;;  %s439_s4 = inlined_call_operand.vmem [shape: f32[1,128], index: 4, kind: input, shape index: {}]   ;;  %s440_s5 = inlined_call_operand.vmem [shape: bf16[128,4], index: 5, kind: input, shape index: {}]   ;;  %s441_s6 = inlined_call_operand.vmem [shape: f32[1,4], index: 6, kind: input, shape index: {}]   ;;  %s442_s7 = inlined_call_operand.vmem [shape: f32[8,4], index: 7, kind: output, shape index: {}]  }
   0x1   :  { %v30_v0 = vld [vmem:[%s435_s1 + $0x8] sm:$0xf]  ;;  %v314_v2 = vld [vmem:[%s436_s3 + $0x38] sm:$0xff]  ;;  %v313_v4 = vld [vmem:[%s436_s3 + $0x30] sm:$0xff] }
   0x2   :  { %v40_v1 = vunpack.c.l.b16 %v30_v0  ;;  %135 = vmatpush.bf16.msra.mxu1 %v314_v2  ;;  %v306_v6 = vld [vmem:[%s435_s1] sm:$0xff]  ;;  %v312_v7 = vld [vmem:[%s436_s3 + $0x28] sm:$0xff]  ;;  %v310_v10 = vld [vmem:[%s436_s3 + $0x18] sm:$0xff] }
   0x3   :  { %v27_v8 = vld [vmem:[%s438_s0] sm:$0xf]  ;;  %v309_v11 = vld [vmem:[%s436_s3 + $0x10] sm:$0xff]  ;;  %v308_v12 = vld [vmem:[%s436_s3 + $0x8] sm:$0xff] }
   0x4   :  { %v42_v3 = vpack.c.b16 %v40_v1, %v40_v1  ;;  %v311_v9 = vld [vmem:[%s436_s3 + $0x20] sm:$0xff]  ;;  %v322_v14 = vld [vmem:[%s440_s5 + $0x38] sm:$0xff]  ;;  %v321_v15 = vld [vmem:[%s440_s5 + $0x30] sm:$0xff] }
   0x5   :  { %v307_v13 = vld [vmem:[%s436_s3] sm:$0xff]  ;;  %218 = vmatpush.bf16.msra.mxu2 %v322_v14  ;;  %v320_v16 = vld [vmem:[%s440_s5 + $0x28] sm:$0xff]  ;;  %v318_v18 = vld [vmem:[%s440_s5 + $0x18] sm:$0xff] }
   0x6   :  { %v50_v5 = vsel %vm48_vm0, %v42_v3, 0  ;;  %136 = vmatpush.bf16.msra.mxu1 %v313_v4  ;;  %v319_v17 = vld [vmem:[%s440_s5 + $0x20] sm:$0xff]  ;;  %v317_v19 = vld [vmem:[%s440_s5 + $0x10] sm:$0xff]  ;;  %v316_v26 = vld [vmem:[%s440_s5 + $0x8] sm:$0xff] }
   0x7   :  { %58 = vmatpush.bf16.msra.mxu0 %v50_v5  ;;  %v323_v20 = vld [vmem:[%s437_s2] ss:$0 sm:$0xff] }
   0x8   :  { %v315_v27 = vld [vmem:[%s440_s5] sm:$0xff] }
   0x9   :  { %219 = vmatpush.bf16.msra.mxu2 %v321_v15  ;;  %v324_v28 = vld [vmem:[%s439_s4] ss:$0 sm:$0xff] }
   0xa   :  { %137 = vmatpush.bf16.msra.mxu1 %v312_v7  ;;  %v325_v34 = vld [vmem:[%s441_s6] ss:$0 sm:$0xff] }
   0xb   :  { %59 = vmatpush.bf16.msra.mxu0 %v306_v6 }
   0xd   :  { %220 = vmatpush.bf16.msra.mxu2 %v320_v16 }
   0xe   :  { %241 = vmatmul.msk.bf16.vlgmr.msra.gmra.mxu0 %vm44_vm1, %v27_v8  ;;  %138 = vmatpush.bf16.msra.mxu1 %v311_v9 }
  0x11   :  { %221 = vmatpush.bf16.msra.mxu2 %v319_v17 }
  0x12   :  { %139 = vmatpush.bf16.msra.mxu1 %v310_v10 }
  0x15   :  { %222 = vmatpush.bf16.msra.mxu2 %v318_v18 }
  0x16   :  { %140 = vmatpush.bf16.msra.mxu1 %v309_v11 }
  0x19   :  { %223 = vmatpush.bf16.msra.mxu2 %v317_v19 }
  0x1a   :  { %141 = vmatpush.bf16.msra.mxu1 %v308_v12 }
  0x1d   :  { %224 = vmatpush.bf16.msra.mxu2 %v316_v26 }
  0x1e   :  { %142 = vmatpush.bf16.msra.mxu1 %v307_v13 }
  0x21   :  { %225 = vmatpush.bf16.msra.mxu2 %v315_v27 }
  0x8b   :  { %v61_v21 = vpop.f32.mrf.mxu0 }
  0x8c   :  { %v62_v22 = vadd.f32 %v323_v20, %v61_v21 }
  0x8e   :  { %v65_v23 = vmax.f32 %v62_v22, 0.0 }
  0x90   :  { %v66_v24 = vpack.c.bf16 %v65_v23, %v65_v23 }
  0x92   :  { %143 = vmatmul.bf16.vlgmr.msra.gmra.mxu1 %v66_v24 }
  0x93   :  { %v63_v25 = vpop.f32.mrf.mxu0 }
 0x10f   :  { %v144_v29 = vpop.f32.mrf.mxu1 }
 0x110   :  { %v145_v30 = vadd.f32 %v324_v28, %v144_v29 }
 0x112   :  { %v148_v31 = vmax.f32 %v145_v30, 0.0 }
 0x114   :  { %v149_v32 = vpack.c.bf16 %v148_v31, %v148_v31 }
 0x116   :  { %226 = vmatmul.bf16.vlgmr.msra.gmra.mxu2 %v149_v32 }
 0x117   :  { %v146_v33 = vpop.f32.mrf.mxu1 }
 0x199   :  { %v227_v35 = vpop.f32.mrf.mxu2 }
 0x19a   :  { %v228_v36 = vadd.f32 %v325_v34, %v227_v35 }
 0x19c   :  { %232 = vst.msk [vmem:[%s442_s7] sm:$0xff] %vm231_vm2, %v228_v36 }
 0x1a1   :  { %v229_v37 = vpop.f32.mrf.mxu2 }

</bundles_post_ra>
